<compile_context>
chip_gen: v5e
topology: v5e:2x2
jax: 0.10.0
libtpu: 0.0.40
codegen_flags: <defaults>
</compile_context>

<pallas_src>
import math
import functools

import jax
import jax.numpy as jnp
from jax.experimental import pallas as pl
from jax.experimental.pallas import tpu as pltpu


def _qkv_proj_kernel(x_ref, wa_ref, ba_ref, q_ref, k_ref, v_ref,
                     key_ref, val_ref, *, n_head, head_dim, q_scale):
    """c_attn: qkv = x @ W + b, emitted head-split.

    x_ref  : (1, tq, C)        bf16 input tile
    wa_ref : (C, 3C)           bf16 c_attn weight (resident)
    ba_ref : (1, 3C)           f32 c_attn bias
    q_ref  : (1, H, tq, D)     bf16 scaled query      (attention path)
    k_ref  : (1, H, tq, D)     bf16 key               (attention path)
    v_ref  : (1, H, tq, D)     bf16 value             (attention path)
    key_ref: (1, H, tq, D)     f32 key                (`present`)
    val_ref: (1, H, tq, D)     f32 value              (`present`)
    """
    C = n_head * head_dim
    x = x_ref[0]                                              # (tq, C) bf16
    qkv = jnp.dot(x, wa_ref[...],
                  preferred_element_type=jnp.float32) + ba_ref[...]   # (tq, 3C) f32
    for h in range(n_head):                                   # static head split
        lo = h * head_dim
        hi = lo + head_dim
        q_h = qkv[:, lo:hi]
        if q_scale != 1.0:                                    # fold 1/sqrt(D) into q
            q_h = q_h * q_scale
        k_h = qkv[:, C + lo:C + hi]
        v_h = qkv[:, 2 * C + lo:2 * C + hi]
        q_ref[0, h] = q_h.astype(q_ref.dtype)
        k_ref[0, h] = k_h.astype(k_ref.dtype)
        v_ref[0, h] = v_h.astype(v_ref.dtype)
        key_ref[0, h] = k_h                                   # f32 for present
        val_ref[0, h] = v_h


def _flash_attn_kernel(q_ref, k_ref, v_ref, wp_ref, bp_ref, out_ref,
                       m_ref, l_ref, acc_ref, merged_ref, *, n_head, head_dim):
    """Head-batched online-softmax attention over streamed K/V tiles + c_proj.

    q_ref     : (1, H, tq, D)  bf16 pre-scaled query, resident across kv tiles
    k_ref     : (1, H, tk, D)  bf16 current K tile
    v_ref     : (1, H, tk, D)  bf16 current V tile
    wp_ref    : (C, C)         bf16 c_proj weight (resident)
    bp_ref    : (1, C)         f32 c_proj bias
    out_ref   : (1, tq, C)     f32 block output
    m_ref     : (H, tq) f32 scratch — running row max      (lane-dense)
    l_ref     : (H, tq) f32 scratch — running softmax denom (lane-dense)
    acc_ref   : (H, tq, D) f32 scratch — running (unnormalized) attn@V
    merged_ref: (tq, C) bf16 scratch — merged heads for the single c_proj matmul
    """
    qi = pl.program_id(1)
    ki = pl.program_id(2)
    nk = pl.num_programs(2)
    tq = q_ref.shape[2]
    tk = k_ref.shape[2]

    @pl.when(ki == 0)
    def _init():
        m_ref[...] = jnp.full_like(m_ref, -jnp.inf)
        l_ref[...] = jnp.zeros_like(l_ref)
        acc_ref[...] = jnp.zeros_like(acc_ref)

    # Skip kv tiles that lie entirely above the causal diagonal (all masked).
    @pl.when(ki * tk < (qi + 1) * tq)
    def _compute():
        q = q_ref[0]                                          # (H, tq, D) bf16
        k = k_ref[0]                                          # (H, tk, D) bf16
        v = v_ref[0]                                          # (H, tk, D) bf16

        # Batched scores across all heads in one MXU push.
        s = jnp.einsum('htd,hkd->htk', q, k,
                       preferred_element_type=jnp.float32)    # (H, tq, tk) f32

        # Causal mask generated in-kernel; matches torch's w*b - 10000*(1-b).
        row = qi * tq + jax.lax.broadcasted_iota(jnp.int32, (tq, tk), 0)
        col = ki * tk + jax.lax.broadcasted_iota(jnp.int32, (tq, tk), 1)
        s = jnp.where((col <= row)[None, :, :], s, -10000.0)

        m_prev = m_ref[...]                                   # (H, tq)
        m_new = jnp.maximum(m_prev, jnp.max(s, axis=-1))      # (H, tq)
        alpha = jnp.exp(m_prev - m_new)                       # f32 softmax math (v5e-safe)
        p = jnp.exp(s - m_new[:, :, None])                    # (H, tq, tk) f32
        l_ref[...] = alpha * l_ref[...] + jnp.sum(p, axis=-1)
        pv = jnp.einsum('htk,hkd->htd', p.astype(jnp.bfloat16), v,
                        preferred_element_type=jnp.float32)   # (H, tq, D)
        acc_ref[...] = alpha[:, :, None] * acc_ref[...] + pv
        m_ref[...] = m_new

    @pl.when(ki == nk - 1)
    def _finalize():
        inv_l = pl.reciprocal(l_ref[...], approx=True)        # (H, tq), EUP
        norm = (acc_ref[...] * inv_l[:, :, None]).astype(jnp.bfloat16)
        # Merge heads into (tq, C) once per q tile (H narrow stores, amortized
        # over all kv steps), then a single full-C-deep c_proj matmul.
        for h in range(n_head):
            merged_ref[:, h * head_dim:(h + 1) * head_dim] = norm[h]
        out = jnp.dot(merged_ref[...], wp_ref[...],
                      preferred_element_type=jnp.float32)
        # TODO(synk): attn_dropout / resid_dropout are identity in eval mode.
        out_ref[0] = (out + bp_ref[...]).astype(out_ref.dtype)


def gpt2_attention(x, w_attn, b_attn, w_proj, b_proj, *, n_head, scale=True,
                   q_tile=256, kv_tile=256):
    """Returns (a, present) like Attention.forward (no past, no masks)."""
    B, T, C = x.shape
    assert C % n_head == 0
    D = C // n_head
    tq = min(q_tile, T)
    tk = min(kv_tile, T)
    assert T % tq == 0 and T % tk == 0

    # bf16 operands for the MXU; biases stay f32.
    x_bf = x.astype(jnp.bfloat16)
    wa_bf = w_attn.astype(jnp.bfloat16)
    wp_bf = w_proj.astype(jnp.bfloat16)
    ba = b_attn.reshape(1, 3 * C).astype(jnp.float32)
    bp = b_proj.reshape(1, C).astype(jnp.float32)

    vmem_limit = 48 * 1024 * 1024  # fits v7x's 64 MiB physical, ample on v5e/v6e

    # ---- kernel 1: c_attn projection + head split ---------------------------
    proj_kernel = functools.partial(
        _qkv_proj_kernel, n_head=n_head, head_dim=D,
        q_scale=(1.0 / math.sqrt(D)) if scale else 1.0)

    hd_shape = (B, n_head, T, D)
    hd_spec = pl.BlockSpec((1, n_head, tq, D), lambda b, i: (b, 0, i, 0))

    q_hd, k_hd, v_hd, key_f32, val_f32 = pl.pallas_call(
        proj_kernel,
        out_shape=(jax.ShapeDtypeStruct(hd_shape, jnp.bfloat16),   # Q (internal)
                   jax.ShapeDtypeStruct(hd_shape, jnp.bfloat16),   # K (internal)
                   jax.ShapeDtypeStruct(hd_shape, jnp.bfloat16),   # V (internal)
                   jax.ShapeDtypeStruct(hd_shape, jnp.float32),    # key  (present)
                   jax.ShapeDtypeStruct(hd_shape, jnp.float32)),   # value(present)
        grid_spec=pltpu.PrefetchScalarGridSpec(
            num_scalar_prefetch=0,
            grid=(B, T // tq),
            in_specs=[
                pl.BlockSpec((1, tq, C), lambda b, i: (b, i, 0)),   # x
                pl.BlockSpec((C, 3 * C), lambda b, i: (0, 0)),      # c_attn.weight
                pl.BlockSpec((1, 3 * C), lambda b, i: (0, 0)),      # c_attn.bias
            ],
            out_specs=[hd_spec, hd_spec, hd_spec, hd_spec, hd_spec],
        ),
        compiler_params=pltpu.CompilerParams(
            dimension_semantics=("parallel", "parallel"),
            vmem_limit_bytes=vmem_limit),
    )(x_bf, wa_bf, ba)

    # ---- kernel 2: flash attention + c_proj ---------------------------------
    attn_kernel = functools.partial(_flash_attn_kernel, n_head=n_head, head_dim=D)

    def kv_index_map(b, qi, ki):
        # Clamp to the last kv tile that is needed for this q tile so skipped
        # (fully-masked) grid steps keep the same block index => no re-DMA.
        last = ((qi + 1) * tq - 1) // tk
        return (b, 0, jnp.minimum(ki, last), 0)

    out = pl.pallas_call(
        attn_kernel,
        out_shape=jax.ShapeDtypeStruct((B, T, C), jnp.float32),
        grid_spec=pltpu.PrefetchScalarGridSpec(
            num_scalar_prefetch=0,
            grid=(B, T // tq, T // tk),
            in_specs=[
                pl.BlockSpec((1, n_head, tq, D),
                             lambda b, qi, ki: (b, 0, qi, 0)),       # Q (resident)
                pl.BlockSpec((1, n_head, tk, D), kv_index_map),      # K tile (bf16)
                pl.BlockSpec((1, n_head, tk, D), kv_index_map),      # V tile (bf16)
                pl.BlockSpec((C, C), lambda b, qi, ki: (0, 0)),      # c_proj.weight
                pl.BlockSpec((1, C), lambda b, qi, ki: (0, 0)),      # c_proj.bias
            ],
            out_specs=pl.BlockSpec((1, tq, C), lambda b, qi, ki: (b, qi, 0)),
            scratch_shapes=[
                pltpu.VMEM((n_head, tq), jnp.float32),      # running max (lane-dense)
                pltpu.VMEM((n_head, tq), jnp.float32),      # running denom
                pltpu.VMEM((n_head, tq, D), jnp.float32),   # running attn@V
                pltpu.VMEM((tq, C), jnp.bfloat16),          # merged heads for c_proj
            ],
        ),
        compiler_params=pltpu.CompilerParams(
            dimension_semantics=("parallel", "parallel", "arbitrary"),
            vmem_limit_bytes=vmem_limit),
    )(q_hd, k_hd, v_hd, wp_bf, bp)

    # present = stack(key, value), already head-split (B, H, T, D) from kernel 1.
    present = jnp.stack([key_f32, val_f32])                   # (2, B, H, T, D)
    return out, present


def _reference(x, w_attn, b_attn, w_proj, b_proj, *, n_head, scale=True):
    """Pure-JAX f32 reference mirroring the torch module (eval mode)."""
    B, T, C = x.shape
    D = C // n_head
    qkv = x @ w_attn + b_attn
    q, k, v = jnp.split(qkv, 3, axis=2)
    q = q.reshape(B, T, n_head, D).transpose(0, 2, 1, 3)         # (B,H,T,D)
    kT = k.reshape(B, T, n_head, D).transpose(0, 2, 3, 1)        # (B,H,D,T)
    v = v.reshape(B, T, n_head, D).transpose(0, 2, 1, 3)         # (B,H,T,D)
    w = jnp.einsum('bhtd,bhds->bhts', q, kT)
    if scale:
        w = w / math.sqrt(D)
    b = jnp.tril(jnp.ones((T, T), jnp.float32))[None, None]
    w = w * b - 10000.0 * (1 - b)
    w = jax.nn.softmax(w, axis=-1)
    a = jnp.einsum('bhts,bhsd->bhtd', w, v)
    a = a.transpose(0, 2, 1, 3).reshape(B, T, C)
    out = a @ w_proj + b_proj
    present = jnp.stack([jnp.swapaxes(kT, -2, -1), v])
    return out, present


if __name__ == "__main__":
    B, T, C, n_head = 2, 8, 32, 4

    key = jax.random.PRNGKey(0)
    k1, k2, k3, k4, k5 = jax.random.split(key, 5)
    x = jax.random.normal(k1, (B, T, C), jnp.float32)
    w_attn = 0.02 * jax.random.normal(k2, (C, 3 * C), jnp.float32)
    b_attn = 0.02 * jax.random.normal(k3, (3 * C,), jnp.float32)
    w_proj = 0.02 * jax.random.normal(k4, (C, C), jnp.float32)
    b_proj = 0.02 * jax.random.normal(k5, (C,), jnp.float32)

    out, present = gpt2_attention(x, w_attn, b_attn, w_proj, b_proj,
                                  n_head=n_head, scale=True)
    jax.block_until_ready(out)
    jax.block_until_ready(present)

    ref_out, ref_present = _reference(x, w_attn, b_attn, w_proj, b_proj,
                                      n_head=n_head, scale=True)
    # bf16 matmuls (f32 accumulation) + approx reciprocal => loosened tolerance
    # versus the pure-f32 reference.
    assert jnp.allclose(out, ref_out, atol=2e-2, rtol=2e-2), (
        float(jnp.max(jnp.abs(out - ref_out))))
    assert jnp.allclose(present, ref_present, atol=2e-2, rtol=2e-2), (
        float(jnp.max(jnp.abs(present - ref_present))))

    print("KERNEL_OK")
</pallas_src>

<mosaic_0001>
module attributes {stable_mosaic.version = 11 : i64} {
  func.func @_qkv_proj_kernel(%arg0: i32, %arg1: i32, %arg2: memref<1x8x32xbf16, #tpu.memory_space<vmem>>, %arg3: memref<32x96xbf16, #tpu.memory_space<vmem>>, %arg4: memref<1x96xf32, #tpu.memory_space<vmem>>, %arg5: memref<1x4x8x8xbf16, #tpu.memory_space<vmem>>, %arg6: memref<1x4x8x8xbf16, #tpu.memory_space<vmem>>, %arg7: memref<1x4x8x8xbf16, #tpu.memory_space<vmem>>, %arg8: memref<1x4x8x8xf32, #tpu.memory_space<vmem>>, %arg9: memref<1x4x8x8xf32, #tpu.memory_space<vmem>>) attributes {dimension_semantics = [#tpu.dimension_semantics<parallel>, #tpu.dimension_semantics<parallel>], iteration_bounds = array<i64: 2, 1>, scalar_prefetch = 0 : i64, scratch_operands = 0 : i64, tpu.core_type = #tpu.core_type<tc>, window_params = [{transform_indices = @transform_0, window_bounds = array<i64: 1, 8, 32>}, {pipeline_mode = #tpu.pipeline_mode<synchronous>, transform_indices = @transform_1, window_bounds = array<i64: 32, 96>}, {pipeline_mode = #tpu.pipeline_mode<synchronous>, transform_indices = @transform_2, window_bounds = array<i64: 1, 96>}, {transform_indices = @transform_3, window_bounds = array<i64: 1, 4, 8, 8>}, {transform_indices = @transform_4, window_bounds = array<i64: 1, 4, 8, 8>}, {transform_indices = @transform_5, window_bounds = array<i64: 1, 4, 8, 8>}, {transform_indices = @transform_6, window_bounds = array<i64: 1, 4, 8, 8>}, {transform_indices = @transform_7, window_bounds = array<i64: 1, 4, 8, 8>}]} {
    %c0 = arith.constant 0 : index
    %c0_0 = arith.constant 0 : index
    %c0_1 = arith.constant 0 : index
    %0 = vector.load %arg2[%c0, %c0_0, %c0_1] : memref<1x8x32xbf16, #tpu.memory_space<vmem>>, vector<1x8x32xbf16>
    %1 = vector.shape_cast %0 : vector<1x8x32xbf16> to vector<8x32xbf16>
    %c0_2 = arith.constant 0 : index
    %c0_3 = arith.constant 0 : index
    %2 = vector.load %arg3[%c0_2, %c0_3] : memref<32x96xbf16, #tpu.memory_space<vmem>>, vector<32x96xbf16>
    %cst = arith.constant dense<0.000000e+00> : vector<8x96xf32>
    %3 = tpu.matmul %1, %2, %cst {dimension_numbers = #tpu.dot_dimension_numbers<[1], [0], [0], [1], [0, 0, 1, 1], [], []>} : vector<8x32xbf16>, vector<32x96xbf16>, vector<8x96xf32> -> vector<8x96xf32>
    %c0_4 = arith.constant 0 : index
    %c0_5 = arith.constant 0 : index
    %4 = vector.load %arg4[%c0_4, %c0_5] : memref<1x96xf32, #tpu.memory_space<vmem>>, vector<1x96xf32>
    %5 = vector.broadcast %4 : vector<1x96xf32> to vector<8x96xf32>
    %6 = arith.addf %3, %5 : vector<8x96xf32>
    %7 = vector.extract_strided_slice %6 {offsets = [0, 0], sizes = [8, 8], strides = [1, 1]} : vector<8x96xf32> to vector<8x8xf32>
    %cst_6 = arith.constant 0.353553385 : f32
    %8 = vector.broadcast %cst_6 : f32 to vector<8x8xf32>
    %9 = arith.mulf %7, %8 : vector<8x8xf32>
    %10 = vector.extract_strided_slice %6 {offsets = [0, 32], sizes = [8, 8], strides = [1, 1]} : vector<8x96xf32> to vector<8x8xf32>
    %11 = vector.extract_strided_slice %6 {offsets = [0, 64], sizes = [8, 8], strides = [1, 1]} : vector<8x96xf32> to vector<8x8xf32>
    %12 = arith.truncf %9 : vector<8x8xf32> to vector<8x8xbf16>
    %c0_7 = arith.constant 0 : index
    %c0_8 = arith.constant 0 : index
    %c0_9 = arith.constant 0 : index
    %c0_10 = arith.constant 0 : index
    %13 = vector.load %arg5[%c0_7, %c0_8, %c0_9, %c0_10] : memref<1x4x8x8xbf16, #tpu.memory_space<vmem>>, vector<1x1x8x8xbf16>
    %14 = vector.shape_cast %13 : vector<1x1x8x8xbf16> to vector<8x8xbf16>
    %15 = vector.shape_cast %12 : vector<8x8xbf16> to vector<1x1x8x8xbf16>
    tpu.vector_store %arg5[%c0_7, %c0_8, %c0_9, %c0_10], %15 {strides = array<i32>} : memref<1x4x8x8xbf16, #tpu.memory_space<vmem>>, vector<1x1x8x8xbf16>,
    %16 = arith.truncf %10 : vector<8x8xf32> to vector<8x8xbf16>
    %c0_11 = arith.constant 0 : index
    %c0_12 = arith.constant 0 : index
    %c0_13 = arith.constant 0 : index
    %c0_14 = arith.constant 0 : index
    %17 = vector.load %arg6[%c0_11, %c0_12, %c0_13, %c0_14] : memref<1x4x8x8xbf16, #tpu.memory_space<vmem>>, vector<1x1x8x8xbf16>
    %18 = vector.shape_cast %17 : vector<1x1x8x8xbf16> to vector<8x8xbf16>
    %19 = vector.shape_cast %16 : vector<8x8xbf16> to vector<1x1x8x8xbf16>
    tpu.vector_store %arg6[%c0_11, %c0_12, %c0_13, %c0_14], %19 {strides = array<i32>} : memref<1x4x8x8xbf16, #tpu.memory_space<vmem>>, vector<1x1x8x8xbf16>,
    %20 = arith.truncf %11 : vector<8x8xf32> to vector<8x8xbf16>
    %c0_15 = arith.constant 0 : index
    %c0_16 = arith.constant 0 : index
    %c0_17 = arith.constant 0 : index
    %c0_18 = arith.constant 0 : index
    %21 = vector.load %arg7[%c0_15, %c0_16, %c0_17, %c0_18] : memref<1x4x8x8xbf16, #tpu.memory_space<vmem>>, vector<1x1x8x8xbf16>
    %22 = vector.shape_cast %21 : vector<1x1x8x8xbf16> to vector<8x8xbf16>
    %23 = vector.shape_cast %20 : vector<8x8xbf16> to vector<1x1x8x8xbf16>
    tpu.vector_store %arg7[%c0_15, %c0_16, %c0_17, %c0_18], %23 {strides = array<i32>} : memref<1x4x8x8xbf16, #tpu.memory_space<vmem>>, vector<1x1x8x8xbf16>,
    %c0_19 = arith.constant 0 : index
    %c0_20 = arith.constant 0 : index
    %c0_21 = arith.constant 0 : index
    %c0_22 = arith.constant 0 : index
    %24 = vector.load %arg8[%c0_19, %c0_20, %c0_21, %c0_22] : memref<1x4x8x8xf32, #tpu.memory_space<vmem>>, vector<1x1x8x8xf32>
    %25 = vector.shape_cast %24 : vector<1x1x8x8xf32> to vector<8x8xf32>
    %26 = vector.shape_cast %10 : vector<8x8xf32> to vector<1x1x8x8xf32>
    tpu.vector_store %arg8[%c0_19, %c0_20, %c0_21, %c0_22], %26 {strides = array<i32>} : memref<1x4x8x8xf32, #tpu.memory_space<vmem>>, vector<1x1x8x8xf32>,
    %c0_23 = arith.constant 0 : index
    %c0_24 = arith.constant 0 : index
    %c0_25 = arith.constant 0 : index
    %c0_26 = arith.constant 0 : index
    %27 = vector.load %arg9[%c0_23, %c0_24, %c0_25, %c0_26] : memref<1x4x8x8xf32, #tpu.memory_space<vmem>>, vector<1x1x8x8xf32>
    %28 = vector.shape_cast %27 : vector<1x1x8x8xf32> to vector<8x8xf32>
    %29 = vector.shape_cast %11 : vector<8x8xf32> to vector<1x1x8x8xf32>
    tpu.vector_store %arg9[%c0_23, %c0_24, %c0_25, %c0_26], %29 {strides = array<i32>} : memref<1x4x8x8xf32, #tpu.memory_space<vmem>>, vector<1x1x8x8xf32>,
    %30 = vector.extract_strided_slice %6 {offsets = [0, 8], sizes = [8, 8], strides = [1, 1]} : vector<8x96xf32> to vector<8x8xf32>
    %cst_27 = arith.constant 0.353553385 : f32
    %31 = vector.broadcast %cst_27 : f32 to vector<8x8xf32>
    %32 = arith.mulf %30, %31 : vector<8x8xf32>
    %33 = vector.extract_strided_slice %6 {offsets = [0, 40], sizes = [8, 8], strides = [1, 1]} : vector<8x96xf32> to vector<8x8xf32>
    %34 = vector.extract_strided_slice %6 {offsets = [0, 72], sizes = [8, 8], strides = [1, 1]} : vector<8x96xf32> to vector<8x8xf32>
    %35 = arith.truncf %32 : vector<8x8xf32> to vector<8x8xbf16>
    %c0_28 = arith.constant 0 : index
    %c1 = arith.constant 1 : index
    %c0_29 = arith.constant 0 : index
    %c0_30 = arith.constant 0 : index
    %36 = vector.load %arg5[%c0_28, %c1, %c0_29, %c0_30] : memref<1x4x8x8xbf16, #tpu.memory_space<vmem>>, vector<1x1x8x8xbf16>
    %37 = vector.shape_cast %36 : vector<1x1x8x8xbf16> to vector<8x8xbf16>
    %38 = vector.shape_cast %35 : vector<8x8xbf16> to vector<1x1x8x8xbf16>
    tpu.vector_store %arg5[%c0_28, %c1, %c0_29, %c0_30], %38 {strides = array<i32>} : memref<1x4x8x8xbf16, #tpu.memory_space<vmem>>, vector<1x1x8x8xbf16>,
    %39 = arith.truncf %33 : vector<8x8xf32> to vector<8x8xbf16>
    %c0_31 = arith.constant 0 : index
    %c1_32 = arith.constant 1 : index
    %c0_33 = arith.constant 0 : index
    %c0_34 = arith.constant 0 : index
    %40 = vector.load %arg6[%c0_31, %c1_32, %c0_33, %c0_34] : memref<1x4x8x8xbf16, #tpu.memory_space<vmem>>, vector<1x1x8x8xbf16>
    %41 = vector.shape_cast %40 : vector<1x1x8x8xbf16> to vector<8x8xbf16>
    %42 = vector.shape_cast %39 : vector<8x8xbf16> to vector<1x1x8x8xbf16>
    tpu.vector_store %arg6[%c0_31, %c1_32, %c0_33, %c0_34], %42 {strides = array<i32>} : memref<1x4x8x8xbf16, #tpu.memory_space<vmem>>, vector<1x1x8x8xbf16>,
    %43 = arith.truncf %34 : vector<8x8xf32> to vector<8x8xbf16>
    %c0_35 = arith.constant 0 : index
    %c1_36 = arith.constant 1 : index
    %c0_37 = arith.constant 0 : index
    %c0_38 = arith.constant 0 : index
    %44 = vector.load %arg7[%c0_35, %c1_36, %c0_37, %c0_38] : memref<1x4x8x8xbf16, #tpu.memory_space<vmem>>, vector<1x1x8x8xbf16>
    %45 = vector.shape_cast %44 : vector<1x1x8x8xbf16> to vector<8x8xbf16>
    %46 = vector.shape_cast %43 : vector<8x8xbf16> to vector<1x1x8x8xbf16>
    tpu.vector_store %arg7[%c0_35, %c1_36, %c0_37, %c0_38], %46 {strides = array<i32>} : memref<1x4x8x8xbf16, #tpu.memory_space<vmem>>, vector<1x1x8x8xbf16>,
    %c0_39 = arith.constant 0 : index
    %c1_40 = arith.constant 1 : index
    %c0_41 = arith.constant 0 : index
    %c0_42 = arith.constant 0 : index
    %47 = vector.load %arg8[%c0_39, %c1_40, %c0_41, %c0_42] : memref<1x4x8x8xf32, #tpu.memory_space<vmem>>, vector<1x1x8x8xf32>
    %48 = vector.shape_cast %47 : vector<1x1x8x8xf32> to vector<8x8xf32>
    %49 = vector.shape_cast %33 : vector<8x8xf32> to vector<1x1x8x8xf32>
    tpu.vector_store %arg8[%c0_39, %c1_40, %c0_41, %c0_42], %49 {strides = array<i32>} : memref<1x4x8x8xf32, #tpu.memory_space<vmem>>, vector<1x1x8x8xf32>,
    %c0_43 = arith.constant 0 : index
    %c1_44 = arith.constant 1 : index
    %c0_45 = arith.constant 0 : index
    %c0_46 = arith.constant 0 : index
    %50 = vector.load %arg9[%c0_43, %c1_44, %c0_45, %c0_46] : memref<1x4x8x8xf32, #tpu.memory_space<vmem>>, vector<1x1x8x8xf32>
    %51 = vector.shape_cast %50 : vector<1x1x8x8xf32> to vector<8x8xf32>
    %52 = vector.shape_cast %34 : vector<8x8xf32> to vector<1x1x8x8xf32>
    tpu.vector_store %arg9[%c0_43, %c1_44, %c0_45, %c0_46], %52 {strides = array<i32>} : memref<1x4x8x8xf32, #tpu.memory_space<vmem>>, vector<1x1x8x8xf32>,
    %53 = vector.extract_strided_slice %6 {offsets = [0, 16], sizes = [8, 8], strides = [1, 1]} : vector<8x96xf32> to vector<8x8xf32>
    %cst_47 = arith.constant 0.353553385 : f32
    %54 = vector.broadcast %cst_47 : f32 to vector<8x8xf32>
    %55 = arith.mulf %53, %54 : vector<8x8xf32>
    %56 = vector.extract_strided_slice %6 {offsets = [0, 48], sizes = [8, 8], strides = [1, 1]} : vector<8x96xf32> to vector<8x8xf32>
    %57 = vector.extract_strided_slice %6 {offsets = [0, 80], sizes = [8, 8], strides = [1, 1]} : vector<8x96xf32> to vector<8x8xf32>
    %58 = arith.truncf %55 : vector<8x8xf32> to vector<8x8xbf16>
    %c0_48 = arith.constant 0 : index
    %c2 = arith.constant 2 : index
    %c0_49 = arith.constant 0 : index
    %c0_50 = arith.constant 0 : index
    %59 = vector.load %arg5[%c0_48, %c2, %c0_49, %c0_50] : memref<1x4x8x8xbf16, #tpu.memory_space<vmem>>, vector<1x1x8x8xbf16>
    %60 = vector.shape_cast %59 : vector<1x1x8x8xbf16> to vector<8x8xbf16>
    %61 = vector.shape_cast %58 : vector<8x8xbf16> to vector<1x1x8x8xbf16>
    tpu.vector_store %arg5[%c0_48, %c2, %c0_49, %c0_50], %61 {strides = array<i32>} : memref<1x4x8x8xbf16, #tpu.memory_space<vmem>>, vector<1x1x8x8xbf16>,
    %62 = arith.truncf %56 : vector<8x8xf32> to vector<8x8xbf16>
    %c0_51 = arith.constant 0 : index
    %c2_52 = arith.constant 2 : index
    %c0_53 = arith.constant 0 : index
    %c0_54 = arith.constant 0 : index
    %63 = vector.load %arg6[%c0_51, %c2_52, %c0_53, %c0_54] : memref<1x4x8x8xbf16, #tpu.memory_space<vmem>>, vector<1x1x8x8xbf16>
    %64 = vector.shape_cast %63 : vector<1x1x8x8xbf16> to vector<8x8xbf16>
    %65 = vector.shape_cast %62 : vector<8x8xbf16> to vector<1x1x8x8xbf16>
    tpu.vector_store %arg6[%c0_51, %c2_52, %c0_53, %c0_54], %65 {strides = array<i32>} : memref<1x4x8x8xbf16, #tpu.memory_space<vmem>>, vector<1x1x8x8xbf16>,
    %66 = arith.truncf %57 : vector<8x8xf32> to vector<8x8xbf16>
    %c0_55 = arith.constant 0 : index
    %c2_56 = arith.constant 2 : index
    %c0_57 = arith.constant 0 : index
    %c0_58 = arith.constant 0 : index
    %67 = vector.load %arg7[%c0_55, %c2_56, %c0_57, %c0_58] : memref<1x4x8x8xbf16, #tpu.memory_space<vmem>>, vector<1x1x8x8xbf16>
    %68 = vector.shape_cast %67 : vector<1x1x8x8xbf16> to vector<8x8xbf16>
    %69 = vector.shape_cast %66 : vector<8x8xbf16> to vector<1x1x8x8xbf16>
    tpu.vector_store %arg7[%c0_55, %c2_56, %c0_57, %c0_58], %69 {strides = array<i32>} : memref<1x4x8x8xbf16, #tpu.memory_space<vmem>>, vector<1x1x8x8xbf16>,
    %c0_59 = arith.constant 0 : index
    %c2_60 = arith.constant 2 : index
    %c0_61 = arith.constant 0 : index
    %c0_62 = arith.constant 0 : index
    %70 = vector.load %arg8[%c0_59, %c2_60, %c0_61, %c0_62] : memref<1x4x8x8xf32, #tpu.memory_space<vmem>>, vector<1x1x8x8xf32>
    %71 = vector.shape_cast %70 : vector<1x1x8x8xf32> to vector<8x8xf32>
    %72 = vector.shape_cast %56 : vector<8x8xf32> to vector<1x1x8x8xf32>
    tpu.vector_store %arg8[%c0_59, %c2_60, %c0_61, %c0_62], %72 {strides = array<i32>} : memref<1x4x8x8xf32, #tpu.memory_space<vmem>>, vector<1x1x8x8xf32>,
    %c0_63 = arith.constant 0 : index
    %c2_64 = arith.constant 2 : index
    %c0_65 = arith.constant 0 : index
    %c0_66 = arith.constant 0 : index
    %73 = vector.load %arg9[%c0_63, %c2_64, %c0_65, %c0_66] : memref<1x4x8x8xf32, #tpu.memory_space<vmem>>, vector<1x1x8x8xf32>
    %74 = vector.shape_cast %73 : vector<1x1x8x8xf32> to vector<8x8xf32>
    %75 = vector.shape_cast %57 : vector<8x8xf32> to vector<1x1x8x8xf32>
    tpu.vector_store %arg9[%c0_63, %c2_64, %c0_65, %c0_66], %75 {strides = array<i32>} : memref<1x4x8x8xf32, #tpu.memory_space<vmem>>, vector<1x1x8x8xf32>,
    %76 = vector.extract_strided_slice %6 {offsets = [0, 24], sizes = [8, 8], strides = [1, 1]} : vector<8x96xf32> to vector<8x8xf32>
    %cst_67 = arith.constant 0.353553385 : f32
    %77 = vector.broadcast %cst_67 : f32 to vector<8x8xf32>
    %78 = arith.mulf %76, %77 : vector<8x8xf32>
    %79 = vector.extract_strided_slice %6 {offsets = [0, 56], sizes = [8, 8], strides = [1, 1]} : vector<8x96xf32> to vector<8x8xf32>
    %80 = vector.extract_strided_slice %6 {offsets = [0, 88], sizes = [8, 8], strides = [1, 1]} : vector<8x96xf32> to vector<8x8xf32>
    %81 = arith.truncf %78 : vector<8x8xf32> to vector<8x8xbf16>
    %c0_68 = arith.constant 0 : index
    %c3 = arith.constant 3 : index
    %c0_69 = arith.constant 0 : index
    %c0_70 = arith.constant 0 : index
    %82 = vector.load %arg5[%c0_68, %c3, %c0_69, %c0_70] : memref<1x4x8x8xbf16, #tpu.memory_space<vmem>>, vector<1x1x8x8xbf16>
    %83 = vector.shape_cast %82 : vector<1x1x8x8xbf16> to vector<8x8xbf16>
    %84 = vector.shape_cast %81 : vector<8x8xbf16> to vector<1x1x8x8xbf16>
    tpu.vector_store %arg5[%c0_68, %c3, %c0_69, %c0_70], %84 {strides = array<i32>} : memref<1x4x8x8xbf16, #tpu.memory_space<vmem>>, vector<1x1x8x8xbf16>,
    %85 = arith.truncf %79 : vector<8x8xf32> to vector<8x8xbf16>
    %c0_71 = arith.constant 0 : index
    %c3_72 = arith.constant 3 : index
    %c0_73 = arith.constant 0 : index
    %c0_74 = arith.constant 0 : index
    %86 = vector.load %arg6[%c0_71, %c3_72, %c0_73, %c0_74] : memref<1x4x8x8xbf16, #tpu.memory_space<vmem>>, vector<1x1x8x8xbf16>
    %87 = vector.shape_cast %86 : vector<1x1x8x8xbf16> to vector<8x8xbf16>
    %88 = vector.shape_cast %85 : vector<8x8xbf16> to vector<1x1x8x8xbf16>
    tpu.vector_store %arg6[%c0_71, %c3_72, %c0_73, %c0_74], %88 {strides = array<i32>} : memref<1x4x8x8xbf16, #tpu.memory_space<vmem>>, vector<1x1x8x8xbf16>,
    %89 = arith.truncf %80 : vector<8x8xf32> to vector<8x8xbf16>
    %c0_75 = arith.constant 0 : index
    %c3_76 = arith.constant 3 : index
    %c0_77 = arith.constant 0 : index
    %c0_78 = arith.constant 0 : index
    %90 = vector.load %arg7[%c0_75, %c3_76, %c0_77, %c0_78] : memref<1x4x8x8xbf16, #tpu.memory_space<vmem>>, vector<1x1x8x8xbf16>
    %91 = vector.shape_cast %90 : vector<1x1x8x8xbf16> to vector<8x8xbf16>
    %92 = vector.shape_cast %89 : vector<8x8xbf16> to vector<1x1x8x8xbf16>
    tpu.vector_store %arg7[%c0_75, %c3_76, %c0_77, %c0_78], %92 {strides = array<i32>} : memref<1x4x8x8xbf16, #tpu.memory_space<vmem>>, vector<1x1x8x8xbf16>,
    %c0_79 = arith.constant 0 : index
    %c3_80 = arith.constant 3 : index
    %c0_81 = arith.constant 0 : index
    %c0_82 = arith.constant 0 : index
    %93 = vector.load %arg8[%c0_79, %c3_80, %c0_81, %c0_82] : memref<1x4x8x8xf32, #tpu.memory_space<vmem>>, vector<1x1x8x8xf32>
    %94 = vector.shape_cast %93 : vector<1x1x8x8xf32> to vector<8x8xf32>
    %95 = vector.shape_cast %79 : vector<8x8xf32> to vector<1x1x8x8xf32>
    tpu.vector_store %arg8[%c0_79, %c3_80, %c0_81, %c0_82], %95 {strides = array<i32>} : memref<1x4x8x8xf32, #tpu.memory_space<vmem>>, vector<1x1x8x8xf32>,
    %c0_83 = arith.constant 0 : index
    %c3_84 = arith.constant 3 : index
    %c0_85 = arith.constant 0 : index
    %c0_86 = arith.constant 0 : index
    %96 = vector.load %arg9[%c0_83, %c3_84, %c0_85, %c0_86] : memref<1x4x8x8xf32, #tpu.memory_space<vmem>>, vector<1x1x8x8xf32>
    %97 = vector.shape_cast %96 : vector<1x1x8x8xf32> to vector<8x8xf32>
    %98 = vector.shape_cast %80 : vector<8x8xf32> to vector<1x1x8x8xf32>
    tpu.vector_store %arg9[%c0_83, %c3_84, %c0_85, %c0_86], %98 {strides = array<i32>} : memref<1x4x8x8xf32, #tpu.memory_space<vmem>>, vector<1x1x8x8xf32>,
    return
  }
  func.func @transform_0(%arg0: i32, %arg1: i32) -> (i32, i32, i32) {
    %c0_i32 = arith.constant 0 : i32
    %c0_i32_0 = arith.constant 0 : i32
    return %arg0, %arg1, %c0_i32 : i32, i32, i32
  }
  func.func @transform_1(%arg0: i32, %arg1: i32) -> (i32, i32) {
    %c0_i32 = arith.constant 0 : i32
    %c0_i32_0 = arith.constant 0 : i32
    %c0_i32_1 = arith.constant 0 : i32
    return %c0_i32, %c0_i32_0 : i32, i32
  }
  func.func @transform_2(%arg0: i32, %arg1: i32) -> (i32, i32) {
    %c0_i32 = arith.constant 0 : i32
    %c0_i32_0 = arith.constant 0 : i32
    %c0_i32_1 = arith.constant 0 : i32
    return %c0_i32, %c0_i32_0 : i32, i32
  }
  func.func @transform_3(%arg0: i32, %arg1: i32) -> (i32, i32, i32, i32) {
    %c0_i32 = arith.constant 0 : i32
    %c0_i32_0 = arith.constant 0 : i32
    %c0_i32_1 = arith.constant 0 : i32
    return %arg0, %c0_i32, %arg1, %c0_i32_0 : i32, i32, i32, i32
  }
  func.func @transform_4(%arg0: i32, %arg1: i32) -> (i32, i32, i32, i32) {
    %c0_i32 = arith.constant 0 : i32
    %c0_i32_0 = arith.constant 0 : i32
    %c0_i32_1 = arith.constant 0 : i32
    return %arg0, %c0_i32, %arg1, %c0_i32_0 : i32, i32, i32, i32
  }
  func.func @transform_5(%arg0: i32, %arg1: i32) -> (i32, i32, i32, i32) {
    %c0_i32 = arith.constant 0 : i32
    %c0_i32_0 = arith.constant 0 : i32
    %c0_i32_1 = arith.constant 0 : i32
    return %arg0, %c0_i32, %arg1, %c0_i32_0 : i32, i32, i32, i32
  }
  func.func @transform_6(%arg0: i32, %arg1: i32) -> (i32, i32, i32, i32) {
    %c0_i32 = arith.constant 0 : i32
    %c0_i32_0 = arith.constant 0 : i32
    %c0_i32_1 = arith.constant 0 : i32
    return %arg0, %c0_i32, %arg1, %c0_i32_0 : i32, i32, i32, i32
  }
  func.func @transform_7(%arg0: i32, %arg1: i32) -> (i32, i32, i32, i32) {
    %c0_i32 = arith.constant 0 : i32
    %c0_i32_0 = arith.constant 0 : i32
    %c0_i32_1 = arith.constant 0 : i32
    return %arg0, %c0_i32, %arg1, %c0_i32_0 : i32, i32, i32, i32
  }
}

</mosaic_0001>

<bundles_post_ra>
// kernel: tpu_custom_call.1
= control target key start
LH: loop header
LB: loop body
LE: loop exit
PB: predicated region body
PF: predicated region fallthrough
CT: control target
= control target key end

     0   :  { %s1679_s0 = inlined_call_operand.hbm [shape: bf16[2,8,32], index: 0, kind: input, shape index: {}]   ;;  %s1680_s1 = inlined_call_operand.hbm [shape: bf16[32,96], index: 1, kind: input, shape index: {}]   ;;  %s1681_s2 = inlined_call_operand.vmem [shape: f32[1,96], index: 2, kind: input, shape index: {}]   ;;  %s1682_s3 = inlined_call_operand.hbm [shape: bf16[2,4,8,8], index: 3, kind: output, shape index: {0}]   ;;  %s1683_s4 = inlined_call_operand.hbm [shape: bf16[2,4,8,8], index: 4, kind: output, shape index: {1}]   ;;  %s1684_s5 = inlined_call_operand.hbm [shape: bf16[2,4,8,8], index: 5, kind: output, shape index: {2}]   ;;  %s1685_s6 = inlined_call_operand.hbm [shape: f32[2,4,8,8], index: 6, kind: output, shape index: {3}]   ;;  %s1686_s7 = inlined_call_operand.hbm [shape: f32[2,4,8,8], index: 7, kind: output, shape index: {4}]  }
   0x1   :  { %1698 = sst [smem:[#allocation24_spill]] %s1679_s0 }
   0x2   :  { %1699 = sst [smem:[#allocation25_spill]] %s1680_s1 }
   0x3   :  { %1700 = sst [smem:[#allocation26_spill]] %s1681_s2 }
   0x4   :  { %1701 = sst [smem:[#allocation27_spill]] %s1685_s6 }
   0x5   :  { %13 = vsyncpa [#allocation3], 0 }
   0x6   :  { %15 = vsyncpa [#allocation3 + $0x1], 0 }
   0x7   :  { %16 = vsyncpa [#allocation6], 0 }
   0x8   :  { %17 = vsyncpa [#allocation4], 0 }
   0x9   :  { %19 = vsyncpa [#allocation4 + $0x1], 0 }
   0xa   :  { %20 = vsyncpa [#allocation9], 0 }
   0xb   :  { %22 = vsyncpa [#allocation9 + $0x1], 0 }
   0xc   :  { %23 = vsyncpa [#allocation12], 0 }
   0xd   :  { %25 = vsyncpa [#allocation12 + $0x1], 0  ;;  %s1347_s24 = smov 0   ;;  %s1349_s25 = smov 0  }
   0xe   :  { %s1351_s26 = smov 0   ;;  %s1353_s27 = smov 0  }
   0xf   :  { %s1355_s28 = smov 0   ;;  %s1357_s29 = smov 0  }
  0x10 LB: > { %1702 = sst [smem:[#allocation19_spill]] %s1272_s25  ;;  %s1378_s30 = sadd.s32 4294967295, %s1288_s29   ;;  %s1288_s29 = sphi %s1357_s29, %s31_s29   ;;  %s1284_s28 = sphi %s1355_s28, %s1727_s28   ;;  %s1280_s27 = sphi %s1353_s27, %s1726_s27   ;;  %s1276_s26 = sphi %s1351_s26, %s1725_s26   ;;  %s1272_s25 = sphi %s1349_s25, %s1724_s25   ;;  %s1268_s24 = sphi %s1347_s24, %s1723_s24  }
  0x11   : > { %1703 = sst [smem:[#allocation20_spill]] %s1276_s26  ;;  %p851_p0 = scmp.ge.s32.totalorder %s1288_s29, 1 }
  0x12   : > { %1704 = sst [smem:[#allocation21_spill]] %s1284_s28  ;;  %p66_p1 = scmp.eq.s32.totalorder %s1378_s30, 0 }
  0x13   : > { %p258_p2 = scmp.lt.s32.totalorder %s1288_s29, 3  ;;  %s1705_s1 = sld [smem:[#allocation25_spill]] }
  0x14   : > { %s1290_s12 = smov [#allocation5]   ;;  %p853_p6 = scmp.ge.s32.totalorder %s1288_s29, 2 }
  0x15   : > { %p1386_p3 = pnand %p851_p0, %p258_p2  ;;  %s271_s13 = sshll.u32 %s1290_s12, 4  ;;  %s272_s13 = int_to_ptr.vmem [resolvable:$true] %s271_s13 }
  0x16   : > { %s1291_s14 = smov 64   ;;  %s1292_s15 = smov 4  }
  0x17   : > { %p928_p4 = pneg %p1386_p3  ;;  %s1687_s16 = sadd.s32 4294967294, %s1288_s29  }
  0x18   : > { %s43_s17 = sadd.s32 1, %s1284_s28  ;;  %s52_s18 = sadd.s32 1, %s1276_s26 }
  0x19   : > { %s269_s10 = sshll.u32 %s1705_s1, 4  ;;  %p929_p5 = pnand %p928_p4, %p66_p1  ;;  %s270_s10 = int_to_ptr.hbm [resolvable:$true] %s269_s10 }
  0x1a   : > { %p45_p7 = scmp.ge.s32.totalorder %s43_s17, 2  ;;  %p59_p8 = scmp.ne.s32.totalorder %s1276_s26, %s1272_s25 }
  0x1b   : > { %931 = dma.hbm_to_vmem [thread:$0]  (!%p929_p5), %s270_s10, 256, %s272_s13, [#allocation6], %s1291_s14, %s1291_s14, %s1292_s15  }
  0x1c   : > { %p60_p9 = scmp.eq.s32.totalorder %s1288_s29, 0  ;;  %p65_p10 = scmp.ne.s32.totalorder %s1272_s25, %s1268_s24 }
  0x1d   : > { %s1729_s17 = smov (%p45_p7, %s43_s17), 0  ;;  %p133_p13 = scmp.eq.s32.totalorder %s1378_s30, 1 }
  0x1e   : > { %1707 = sst [smem:[#allocation22_spill]] %s1729_s17  ;;  %p1405_p11 = por %p60_p9, %p59_p8 }
  0x1f   : > { %p1411_p12 = por %p66_p1, %p65_p10  ;;  %s47_s21 = ssub.s32 %s1284_s28, %s1729_s17 }
  0x20   : > { %p50_p0 = scmp.eq.s32.totalorder %s47_s21, 0  ;;  %p139_p2 = scmp.eq.s32.totalorder %s1687_s16, 1 }
  0x21   : > { %p1420_p4 = por %p133_p13, %p59_p8  ;;  %p953_p5 = scmp.lt.s32.totalorder %s1288_s29, 2 }
  0x22   : > { %s1426_s23 = scalar_select %p50_p0, %s1276_s26, %s52_s18  }
  0x23   : > { %p1428_p7 = por %p139_p2, %p65_p10  ;;  %s288_s9 = sand.u32 1, %s1276_s26  }
  0x24   : > { %1711 = sst [smem:[#allocation23_spill]] %s1426_s23  ;;  %s854_s10 = sshll.u32 %s288_s9, 2 }
  0x25   : > { %s855_s12 = sshll.u32 %s1284_s28, 2  ;;  %s1713_s0 = sld [smem:[#allocation24_spill]] }
  0x26   : > { %s292_s21 = scalar_lea.vmem [#allocation2], %s854_s10  ;;  %p933_p8 = pnand %p953_p5, %p1405_p11 }
  0x27   : > { %s301_s16 = sshll.u32 %s292_s21, 4  ;;  %s289_s18 = scalar_lea.sflag [#allocation3], %s288_s9  ;;  %s302_s16 = int_to_ptr.vmem [resolvable:$true] %s301_s16 }
  0x28   : > { %s1442_s17 = sand.u32 (!%p1386_p3), 1, %s1272_s25  }
  0x29   : > { %310 = sbr.rel (%p1386_p3) target bundleno = 387 (0x183), region = 32  ;;  %s857_s13 = sshll.u32 (!%p1386_p3), %s1442_s17, 2 }
  0x2a   : > { %s316_s10 = scalar_lea.vmem (!%p1386_p3), [#allocation2], %s857_s13 }
  0x2b   : > { %s297_s15 = scalar_lea.hbm %s1713_s0, %s855_s12  ;;  %s313_s12 = scalar_lea.sflag (!%p1386_p3), [#allocation3], %s1442_s17 }
  0x2c   : > { %s299_s1 = sshll.u32 %s297_s15, 4  ;;  %s300_s1 = int_to_ptr.hbm [resolvable:$true] %s299_s1 }
  0x2d   : > { %935 = dma.hbm_to_vmem [thread:$0]  (!%p933_p8), %s300_s1, 64, %s302_s16, %s289_s18  }
  0x2e   : > { %1247 = dma.done.wait (%p1411_p12), %s313_s12, 64  }
  0x2f   : > { %1249 = vsyncadd (%p1411_p12), %s313_s12, 4294967232 }
  0x30   : > { %1251 = dma.done.wait (%p66_p1), [#allocation6], 256  }
  0x31   : > { %1253 = vsyncadd (%p66_p1), [#allocation6], 4294967040  ;;  %v906_v0 = vld [vmem:[#allocation5 + $0x8] sm:$0xff]  ;;  %v905_v1 = vld [vmem:[#allocation5] sm:$0xff]  ;;  %vm395_vm0 = vcmask 261120   ;;  %s1714_s2 = sld [smem:[#allocation26_spill]] }
  0x32   : > { %405 = vmatpush.bf16.msra.mxu0 %v906_v0  ;;  %v374_v2 = vld [vmem:[%s316_s10] sm:$0xf]  ;;  %s1458_s16 = sshll.u32 %s1442_s17, 4  ;;  %s1293_s19 = smov 80   ;;  %vm414_vm1 = vcmask 60416   ;;  %vm430_vm2 = vcmask 64512  }
  0x33   : > { %s1294_s20 = smov 88   ;;  %s1295_s9 = smov 96  }
  0x34   : > { %s1461_s14 = scalar_lea.vmem [#allocation7], %s1458_s16  ;;  %s1296_s15 = smov 56  }
  0x35   : > { %s1689_s21 = smov 64   ;;  %s1298_s18 = smov 48  }
  0x36   : > { %406 = vmatpush.bf16.msra.mxu0 %v905_v1  ;;  %s1299_s13 = smov 72   ;;  %s1300_s12 = smov 120  }
  0x37   : > { %v1021_v3 = vld [vmem:[%s1714_s2] ss:$0 sm:$0xff]  ;;  %s1301_s10 = smov 112   ;;  %s1302_s1 = smov 40  }
  0x38   : > { %s1303_s11 = smov 104   ;;  %s1715_s6 = sld [smem:[#allocation27_spill]] }
  0x39   : > { %872 = vmatmul.msk.bf16.vlgmr.msra.gmra.mxu0 %vm395_vm0, %v374_v2 }
  0x3e   : > { %s1102_s0 = scalar_lea.hbm %s1715_s6, 64 }
  0xb6   : > { %v408_v4 = vpop.f32.mrf.mxu0 }
  0xb7   : > { %v409_v5 = vadd.f32 %v1021_v3, %v408_v4 }
  0xb9   : > { %477 = vrot.lane.b32.xlu2 %v409_v5, %s1293_s19  ;;  %452 = vrot.lane.b32.xlu0 %v409_v5, %s1294_s20  ;;  %v412_v6 = vmul.f32 0.35355338, %v409_v5  ;;  %v416_v9 = vpack.c.bf16 %v409_v5, %v409_v5 }
  0xba   : > { %427 = vrot.lane.b32.xlu1 %v409_v5, %s1295_s9 }
  0xbb   : > { %v413_v7 = vpack.c.bf16 %v412_v6, %v412_v6 }
  0xbd   : > { %415 = vst.msk [vmem:[%s1461_s14] sm:$0xf] %vm414_vm1, %v413_v7 }
  0xbe   : > { %v410_v8 = vpop.f32.mrf.mxu0 }
  0xc1   : > { %457 = vrot.lane.b32.xlu0 %v409_v5, %s1296_s15  ;;  %442 = vrot.lane.b32.xlu2 %v416_v9, %s1294_s20  ;;  %s862_s20 = sshll.u32 %s1442_s17, 5 }
  0xc2   : > { %432 = vrot.lane.b32.xlu1 %v409_v5, %s1689_s21 }
  0xc9   : > { %482 = vrot.lane.b32.xlu0 %v409_v5, %s1298_s18  ;;  %447 = vrot.lane.b32.xlu2 %v416_v9, %s1296_s15  ;;  %s1468_s15 = scalar_lea.vmem [#allocation11], %s862_s20 }
  0xca   : > { %502 = vrot.lane.b32.xlu1 %v409_v5, %s1299_s13 }
  0xd1   : > { %472 = vrot.lane.b32.xlu2 %v416_v9, %s1298_s18  ;;  %418 = vrot.lane.b32.xlu0 %v416_v9, %s1295_s9  ;;  %s1478_s9 = scalar_lea.vmem [#allocation10], %s1458_s16  ;;  %s1489_s18 = scalar_lea.vmem [#allocation13], %s862_s20 }
  0xd2   : > { %467 = vrot.lane.b32.xlu1 %v416_v9, %s1293_s19  ;;  %s1473_s19 = scalar_lea.vmem [#allocation8], %s1458_s16  ;;  %s1691_s16 = sshll.u32 %s1280_s27, 5 }
  0xd9   : > { %422 = vrot.lane.b32.xlu0 %v416_v9, %s1689_s21  ;;  %437 = vrot.lane.b32.xlu2 %v413_v7, %s1300_s12 }
  0xda   : > { %462 = vrot.lane.b32.xlu1 %v413_v7, %s1301_s10  ;;  %s599_s10 = scalar_lea.hbm %s1715_s6, %s1691_s16 }
  0xdb   : > { %s602_s20 = sshll.u32 %s599_s10, 4  ;;  %s603_s20 = int_to_ptr.hbm [resolvable:$true] %s602_s20 }
  0xe1   : > { %492 = vrot.lane.b32.xlu0 %v416_v9, %s1299_s13  ;;  %497 = vrot.lane.b32.xlu2 %v416_v9, %s1302_s1  ;;  %s1096_s13 = sshra.s32 %s603_s20, 4  ;;  %s1097_s13 = int_to_ptr.hbm [resolvable:$true] %s1096_s13 }
  0xe2   : > { %487 = vrot.lane.b32.xlu1 %v413_v7, %s1303_s11  ;;  %s1695_s11 = sand.u32 1, %s1378_s30   ;;  %s1098_s12 = scalar_lea.hbm %s1097_s13, 32 }
  0xe3   : > { %s1512_s21 = scalar_lea.sflag [#allocation12], %s1695_s11  ;;  %p1099_p1 = scmp.ne.s32.totalorder %s1097_s13, %s1098_s12 }
  0xe4   : > { %p1103_p10 = scmp.lt.s32.totalorder %s1097_s13, %s1715_s6  ;;  %p1104_p11 = scmp.lt.s32.totalorder %s1102_s0, %s1098_s12 }
  0xe5   : > { %p1100_p3 = pnand %p1099_p1, %p1420_p4 }
  0xe6   : > { %p1105_p12 = por %p1104_p11, %p1103_p10 }
  0xe7   : > { %p1101_p9 = pneg %p1100_p3 }
  0xe9   : > { %507 = vrot.lane.b32.xlu0 %v409_v5, %s1302_s1  ;;  %s600_s1 = sshll.u32 %s1468_s15, 4  ;;  %p1106_p13 = pnand %p1105_p12, %p1101_p9  ;;  %s601_s1 = int_to_ptr.vmem [resolvable:$true] %s600_s1 }
 0x113   : > { %v478_v10 = vpop.permute.xlu2 %477 }
 0x114   : > { %881 = vst.msk [vmem:[%s1468_s15 + $0x10] sm:$0xff] %vm430_vm2, %v478_v10 }
 0x11b   : > { %v443_v11 = vpop.permute.xlu2 %442 }
 0x11c   : > { %874 = vst.msk [vmem:[%s1473_s19 + $0x4] sm:$0xf] %vm414_vm1, %v443_v11 }
 0x123   : > { %v448_v12 = vpop.permute.xlu2 %447 }
 0x124   : > { %875 = vst.msk [vmem:[%s1478_s9 + $0x4] sm:$0xf] %vm414_vm1, %v448_v12 }
 0x12b   : > { %v453_v13 = vpop.permute.xlu0 %452  ;;  %v473_v14 = vpop.permute.xlu2 %472 }
 0x12c   : > { %876 = vst.msk [vmem:[%s1468_s15 + $0x8] sm:$0xff] %vm430_vm2, %v453_v13  ;;  %v428_v15 = vpop.permute.xlu1 %427 }
 0x12d   : > { %431 = vst.msk [vmem:[%s1468_s15] sm:$0xff] %vm430_vm2, %v428_v15 }
 0x12e   : > { %880 = vst.msk [vmem:[%s1478_s9 + $0x8] sm:$0xf] %vm414_vm1, %v473_v14 }
 0x133   : > { %v458_v16 = vpop.permute.xlu0 %457  ;;  %v438_v17 = vpop.permute.xlu2 %437 }
 0x134   : > { %877 = vst.msk [vmem:[%s1489_s18 + $0x8] sm:$0xff] %vm430_vm2, %v458_v16  ;;  %v433_v18 = vpop.permute.xlu1 %432 }
 0x135   : > { %435 = vst.msk [vmem:[%s1489_s18] sm:$0xff] %vm430_vm2, %v433_v18 }
 0x136   : > { %873 = vst.msk [vmem:[%s1461_s14 + $0x4] sm:$0xf] %vm414_vm1, %v438_v17 }
 0x13b   : > { %v483_v19 = vpop.permute.xlu0 %482  ;;  %v498_v20 = vpop.permute.xlu2 %497 }
 0x13c   : > { %882 = vst.msk [vmem:[%s1489_s18 + $0x10] sm:$0xff] %vm430_vm2, %v483_v19  ;;  %v503_v21 = vpop.permute.xlu1 %502 }
 0x13d   : > { %886 = vst.msk [vmem:[%s1468_s15 + $0x18] sm:$0xff] %vm430_vm2, %v503_v21 }
 0x13e   : > { %885 = vst.msk [vmem:[%s1478_s9 + $0xc] sm:$0xf] %vm414_vm1, %v498_v20 }
 0x13f   : > { %1109 = shalt.err (!%p1106_p13)
}
 0x140   : > { %s1693_s15 = smov 128   ;;  %s1694_s16 = smov 8  }
 0x141   : > { %921 = dma.vmem_to_hbm [thread:$0]  (%p1420_p4), %s601_s1, 512, %s603_s20, %s1512_s21, %s1693_s15, %s1693_s15, %s1694_s16  }
 0x142   : > { %s564_s0 = sshll.u32 %s1473_s19, 4  ;;  %s907_s2 = sshll.u32 %s1280_s27, 4  ;;  %s1535_s0 = int_to_ptr.vmem [resolvable:$true] %s564_s0 }
 0x143   : > { %v419_v22 = vpop.permute.xlu0 %418  ;;  %s582_s28 = sshll.u32 %s1478_s9, 4  ;;  %s546_s13 = sshll.u32 %s1461_s14, 4  ;;  %s1545_s28 = int_to_ptr.vmem [resolvable:$true] %s582_s28  ;;  %s1554_s13 = int_to_ptr.vmem [resolvable:$true] %s546_s13 }
 0x144   : > { %v468_v23 = vpop.permute.xlu1 %467  ;;  %421 = vst.msk [vmem:[%s1473_s19] sm:$0xf] %vm414_vm1, %v419_v22  ;;  %s563_s12 = scalar_lea.hbm %s1683_s4, %s907_s2  ;;  %s545_s16 = scalar_lea.hbm %s1682_s3, %s907_s2 }
 0x145   : > { %879 = vst.msk [vmem:[%s1473_s19 + $0x8] sm:$0xf] %vm414_vm1, %v468_v23  ;;  %s581_s23 = scalar_lea.hbm %s1684_s5, %s907_s2  ;;  %s1556_s26 = sshll.u32 %s563_s12, 4  ;;  %s567_s26 = int_to_ptr.hbm [resolvable:$true] %s1556_s26 }
 0x146   : > { %s1558_s1 = sshll.u32 %s545_s16, 4  ;;  %s1560_s20 = sshll.u32 %s581_s23, 4  ;;  %s549_s1 = int_to_ptr.hbm [resolvable:$true] %s1558_s1  ;;  %s585_s20 = int_to_ptr.hbm [resolvable:$true] %s1560_s20 }
 0x147   : > { %s1716_s25 = sshll.u32 %s1280_s27, 5  ;;  %s1717_s23 = sand.u32 1, %s1378_s30  }
 0x148   : > { %s1567_s11 = scalar_lea.hbm %s1686_s7, %s1716_s25  ;;  %s1579_s16 = scalar_lea.sflag [#allocation9], %s1717_s23 }
 0x149   : > { %s620_s6 = sshll.u32 %s1567_s11, 4  ;;  %s1124_s27 = sshra.s32 %s567_s26, 4  ;;  %s1125_s27 = int_to_ptr.hbm [resolvable:$true] %s1124_s27  ;;  %s621_s6 = int_to_ptr.hbm [resolvable:$true] %s620_s6 }
 0x14a   : > { %s1126_s2 = scalar_lea.hbm %s1125_s27, 16  ;;  %p1131_p8 = scmp.lt.s32.totalorder %s1125_s27, %s1683_s4 }
 0x14b   : > { %v423_v24 = vpop.permute.xlu0 %422  ;;  %p1127_p0 = scmp.ne.s32.totalorder %s1125_s27, %s1126_s2 }
 0x14c   : > { %425 = vst.msk [vmem:[%s1478_s9] sm:$0xf] %vm414_vm1, %v423_v24  ;;  %v463_v25 = vpop.permute.xlu1 %462 }
 0x14d   : > { %878 = vst.msk [vmem:[%s1461_s14 + $0x8] sm:$0xf] %vm414_vm1, %v463_v25  ;;  %p1128_p2 = pnand %p1127_p0, %p1420_p4 }
 0x14f   : > { %p1129_p5 = pneg %p1128_p2 }
 0x153   : > { %v493_v26 = vpop.permute.xlu0 %492 }
 0x154   : > { %884 = vst.msk [vmem:[%s1473_s19 + $0xc] sm:$0xf] %vm414_vm1, %v493_v26  ;;  %v488_v27 = vpop.permute.xlu1 %487  ;;  %s1130_s19 = scalar_lea.hbm %s1683_s4, 32 }
 0x155   : > { %883 = vst.msk [vmem:[%s1461_s14 + $0xc] sm:$0xf] %vm414_vm1, %v488_v27  ;;  %p1132_p1 = scmp.lt.s32.totalorder %s1130_s19, %s1126_s2 }
 0x157   : > { %p1133_p3 = por %p1132_p1, %p1131_p8 }
 0x159   : > { %p1134_p9 = pnand %p1133_p3, %p1129_p5 }
 0x15b   : > { %1137 = shalt.err (!%p1134_p9)
}
 0x15c   : > { %s1306_s30 = smov 4   ;;  %s1718_s14 = smov 64  }
 0x15d   : > { %919 = dma.vmem_to_hbm [thread:$0]  (%p1420_p4), %s1535_s0, 256, %s567_s26, %s1579_s16, %s1718_s14, %s1718_s14, %s1306_s30  }
 0x15e   : > { %s513_s10 = scalar_lea.sflag [#allocation4], %s1442_s17  ;;  %s1152_s23 = sshra.s32 %s549_s1, 4  ;;  %s1153_s23 = int_to_ptr.hbm [resolvable:$true] %s1152_s23 }
 0x15f   : > { %s1154_s27 = scalar_lea.hbm %s1153_s23, 16  ;;  %s1158_s12 = scalar_lea.hbm %s1682_s3, 32 }
 0x160   : > { %p1155_p10 = scmp.ne.s32.totalorder %s1153_s23, %s1154_s27  ;;  %p1159_p13 = scmp.lt.s32.totalorder %s1153_s23, %s1682_s3 }
 0x161   : > { %p1160_p0 = scmp.lt.s32.totalorder %s1158_s12, %s1154_s27 }
 0x162   : > { %p1156_p11 = pnand %p1155_p10, %p1420_p4 }
 0x163   : > { %p1161_p2 = por %p1160_p0, %p1159_p13 }
 0x164   : > { %p1157_p12 = pneg %p1156_p11 }
 0x166   : > { %p1162_p5 = pnand %p1161_p2, %p1157_p12 }
 0x168   : > { %1165 = shalt.err (!%p1162_p5)
}
 0x169   : > { %918 = dma.vmem_to_hbm [thread:$0]  (%p1420_p4), %s1554_s13, 256, %s549_s1, %s513_s10, %s1718_s14, %s1718_s14, %s1306_s30  }
 0x16a   : > { %s1180_s26 = sshra.s32 %s585_s20, 4  ;;  %s1186_s23 = scalar_lea.hbm %s1684_s5, 32  ;;  %s1181_s26 = int_to_ptr.hbm [resolvable:$true] %s1180_s26 }
 0x16b   : > { %s1182_s17 = scalar_lea.hbm %s1181_s26, 16  ;;  %p1187_p9 = scmp.lt.s32.totalorder %s1181_s26, %s1684_s5 }
 0x16c   : > { %p1183_p8 = scmp.ne.s32.totalorder %s1181_s26, %s1182_s17  ;;  %p1188_p10 = scmp.lt.s32.totalorder %s1186_s23, %s1182_s17 }
 0x16e   : > { %p1184_p1 = pnand %p1183_p8, %p1420_p4  ;;  %p1189_p11 = por %p1188_p10, %p1187_p9 }
 0x170   : > { %p1185_p3 = pneg %p1184_p1 }
 0x172   : > { %p1190_p12 = pnand %p1189_p11, %p1185_p3 }
 0x174   : > { %1193 = shalt.err (!%p1190_p12)
}
 0x175   : > { %920 = dma.vmem_to_hbm [thread:$0]  (%p1420_p4), %s1545_s28, 256, %s585_s20, %s1579_s16, %s1718_s14, %s1718_s14, %s1306_s30   ;;  %v508_v28 = vpop.permute.xlu0 %507 }
 0x176   : > { %s1719_s13 = sshll.u32 %s1489_s18, 4  ;;  %887 = vst.msk [vmem:[%s1489_s18 + $0x18] sm:$0xff] %vm430_vm2, %v508_v28  ;;  %s1208_s1 = sshra.s32 %s621_s6, 4  ;;  %s619_s13 = int_to_ptr.vmem [resolvable:$true] %s1719_s13  ;;  %s1209_s1 = int_to_ptr.hbm [resolvable:$true] %s1208_s1 }
 0x177   : > { %s1210_s10 = scalar_lea.hbm %s1209_s1, 32  ;;  %s1214_s19 = scalar_lea.hbm %s1686_s7, 64 }
 0x178   : > { %p1211_p13 = scmp.ne.s32.totalorder %s1209_s1, %s1210_s10  ;;  %p1215_p5 = scmp.lt.s32.totalorder %s1209_s1, %s1686_s7 }
 0x179   : > { %p1216_p8 = scmp.lt.s32.totalorder %s1214_s19, %s1210_s10 }
 0x17a   : > { %p1212_p0 = pnand %p1211_p13, %p1420_p4 }
 0x17b   : > { %p1217_p1 = por %p1216_p8, %p1215_p5 }
 0x17c   : > { %p1213_p2 = pneg %p1212_p0 }
 0x17e   : > { %p1218_p3 = pnand %p1217_p1, %p1213_p2 }
 0x180   : > { %1221 = shalt.err (!%p1218_p3)
}
 0x181   : > { %s1720_s18 = smov 8   ;;  %s1721_s11 = smov 128  }
 0x182   : > { %922 = dma.vmem_to_hbm [thread:$0]  (%p1420_p4), %s619_s13, 512, %s621_s6, %s1512_s21, %s1721_s11, %s1721_s11, %s1720_s18  }
 0x183 PF: > { %s635_s20 = sand.u32 1, %s1268_s24   ;;  %p937_p9 = pnand %p853_p6, %p1428_p7 }
 0x184   : > { %s636_s16 = scalar_lea.sflag [#allocation4], %s635_s20 }
 0x185   : > { %p938_p10 = pneg %p937_p9 }
 0x187   : > { %1255 = dma.done.wait (%p938_p10), %s636_s16, 256  }
 0x188   : > { %1257 = vsyncadd (%p938_p10), %s636_s16, 4294967040  ;;  %s1722_s30 = sadd.s32 4294967294, %s1288_s29  }
 0x189   : > { %s645_s22 = sand.u32 1, %s1722_s30  }
 0x18a   : > { %s646_s14 = scalar_lea.sflag [#allocation9], %s645_s22 }
 0x18b   : > { %1259 = dma.done.wait (%p938_p10), %s646_s14, 512  }
 0x18c   : > { %1261 = vsyncadd (%p938_p10), %s646_s14, 4294966784  ;;  %s666_s26 = scalar_lea.sflag [#allocation12], %s645_s22 }
 0x18d   : > { %1263 = dma.done.wait (%p938_p10), %s666_s26, 1024  }
 0x18e   : > { %1265 = vsyncadd (%p938_p10), %s666_s26, 4294966272  ;;  %s31_s29 = sadd.s32 1, %s1288_s29   ;;  %s1723_s24 = sld [smem:[#allocation19_spill]] }
 0x18f   : > { %p28_p4 = scmp.ge.s32.totalorder %s31_s29, 4   ;;  %s1724_s25 = sld [smem:[#allocation20_spill]] }
 0x190   : > { %s1725_s26 = sld [smem:[#allocation23_spill]] }
 0x191   : > { %s1726_s27 = sld [smem:[#allocation21_spill]]  ;;  %30 = sbr.rel (!%p28_p4) target bundleno = 16 (0x10), region = 160 }
 0x192   : > { %s1727_s28 = sld [smem:[#allocation22_spill]] }
 0x196   :  { %682 = vsyncpa [#allocation3], 1 }
 0x197   :  { %684 = vsyncpa [#allocation3 + $0x1], 1 }
 0x198   :  { %685 = vsyncpa [#allocation6], 1 }
 0x199   :  { %686 = vsyncpa [#allocation4], 1 }
 0x19a   :  { %688 = vsyncpa [#allocation4 + $0x1], 1 }
 0x19b   :  { %689 = vsyncpa [#allocation9], 1 }
 0x19c   :  { %691 = vsyncpa [#allocation9 + $0x1], 1 }
 0x19d   :  { %692 = vsyncpa [#allocation12], 1 }
 0x19e   :  { %694 = vsyncpa [#allocation12 + $0x1], 1 }

</bundles_post_ra>
